<compile_context>
chip_gen: v7x
topology: tpu7x:2x2x1
jax: 0.10.0
libtpu: 0.0.40
codegen_flags: <defaults>
</compile_context>

<pallas_src>
from functools import partial

import jax
import jax.numpy as jnp
from jax import lax
from jax.experimental import pallas as pl
from jax.experimental.pallas import tpu as pltpu


def _decoder_kernel(z_ref, w1_ref, gamma_ref, beta_ref, w2_ref, b2_ref,
                    o_ref, acc_ref, *, mm_dtype, neg_slope, eps):
    k = pl.program_id(1)                       # hidden-tile index (reduction axis)

    @pl.when(k == 0)
    def _init():
        acc_ref[...] = jnp.zeros_like(acc_ref)

    # ---- Linear 1 (this hidden tile): (bs, d_in) @ (d_in, TK) ----
    # NOTE: linear-1 bias is intentionally omitted — it cancels exactly in the
    # training-mode BatchNorm that follows.
    h = jnp.dot(z_ref[...].astype(mm_dtype), w1_ref[...].astype(mm_dtype),
                preferred_element_type=jnp.float32)

    # ---- BatchNorm1d, training mode: per-feature stats over the full batch ----
    mean = jnp.mean(h, axis=0, keepdims=True)
    mean_sq = jnp.mean(h * h, axis=0, keepdims=True)
    var = jnp.maximum(mean_sq - mean * mean, 0.0)
    hn = (h - mean) * lax.rsqrt(var + eps)
    hn = hn * gamma_ref[...] + beta_ref[...]

    # ---- LeakyReLU(0.1): single VPU max ----
    a = jnp.maximum(hn, neg_slope * hn)

    # ---- Linear 2, K-contraction over hidden tiles into VMEM accumulator ----
    acc_ref[...] += jnp.dot(a.astype(mm_dtype), w2_ref[...].astype(mm_dtype),
                            preferred_element_type=jnp.float32)

    @pl.when(k == pl.num_programs(1) - 1)
    def _finalize():
        o_ref[...] = (acc_ref[...] + b2_ref[...]).astype(o_ref.dtype)


def _round_up(x, m):
    return (x + m - 1) // m * m


def decoder_z_to_psi(z, w1, b1, gamma, beta, w2, b2, *,
                     mm_dtype=jnp.float32, eps=1e-5, neg_slope=0.1):
    """Forward pass of Decoder_z_to_psi.  Weights are stored transposed w.r.t.
    PyTorch: w1 (d_in, 2*d_in), w2 (2*d_in, d_out)."""
    del b1  # mathematically cancelled by training-mode BatchNorm (kept in API).

    bs, d_in = z.shape
    d_hidden = w1.shape[1]
    d_out = w2.shape[1]

    # Pad feature axes to 128-lane multiples (lane-dense loads/stores).
    d_in_p = _round_up(d_in, 128)
    d_hid_p = _round_up(d_hidden, 128)
    d_out_p = _round_up(d_out, 128)

    # Hidden (K of matmul-2) and output (N) tile sizes: 128-multiples, prefer
    # 256/512 to fill v6e/v7x's 2x256 MXU.  Batch is never tiled (BN stats).
    tk = next(t for t in (512, 256, 128) if d_hid_p % t == 0)
    tn = next(t for t in (256, 128) if d_out_p % t == 0)
    n_j = d_out_p // tn
    n_k = d_hid_p // tk

    f32 = jnp.float32
    z_p = jnp.zeros((bs, d_in_p), f32).at[:, :d_in].set(z.astype(f32))
    w1_p = jnp.zeros((d_in_p, d_hid_p), f32).at[:d_in, :d_hidden].set(w1.astype(f32))
    w2_p = jnp.zeros((d_hid_p, d_out_p), f32).at[:d_hidden, :d_out].set(w2.astype(f32))
    g_p = jnp.ones((1, d_hid_p), f32).at[:, :d_hidden].set(
        gamma.reshape(1, -1).astype(f32))
    bt_p = jnp.zeros((1, d_hid_p), f32).at[:, :d_hidden].set(
        beta.reshape(1, -1).astype(f32))
    b2_p = jnp.zeros((1, d_out_p), f32).at[:, :d_out].set(
        b2.reshape(1, -1).astype(f32))

    if mm_dtype == jnp.bfloat16:
        # Halve HBM traffic for the dominant tensors; BN/activation stay f32.
        z_p, w1_p, w2_p = (x.astype(jnp.bfloat16) for x in (z_p, w1_p, w2_p))

    kernel = partial(_decoder_kernel, mm_dtype=mm_dtype,
                     neg_slope=neg_slope, eps=eps)

    grid_spec = pltpu.PrefetchScalarGridSpec(
        num_scalar_prefetch=0,
        grid=(n_j, n_k),                                    # (parallel, arbitrary)
        in_specs=[
            pl.BlockSpec((bs, d_in_p), lambda j, k: (0, 0)),   # z (stays resident)
            pl.BlockSpec((d_in_p, tk), lambda j, k: (0, k)),   # W1 column tile
            pl.BlockSpec((1, tk),      lambda j, k: (0, k)),   # BN gamma tile
            pl.BlockSpec((1, tk),      lambda j, k: (0, k)),   # BN beta tile
            pl.BlockSpec((tk, tn),     lambda j, k: (k, j)),   # W2 tile
            pl.BlockSpec((1, tn),      lambda j, k: (0, j)),   # b2 tile
        ],
        out_specs=pl.BlockSpec((bs, tn), lambda j, k: (0, j)),
        scratch_shapes=[pltpu.VMEM((bs, tn), jnp.float32)],    # accumulator
    )

    elt = 2 if mm_dtype == jnp.bfloat16 else 4
    cost = pl.CostEstimate(
        flops=n_j * 2 * bs * d_in_p * d_hid_p + 2 * bs * d_hid_p * d_out_p,
        transcendentals=n_j * d_hid_p,                      # rsqrt per feature
        bytes_accessed=(z_p.size + w1_p.size + w2_p.size) * elt
                       + (g_p.size + bt_p.size + b2_p.size + bs * d_out_p) * 4,
    )

    out_p = pl.pallas_call(
        kernel,
        out_shape=jax.ShapeDtypeStruct((bs, d_out_p), jnp.float32),
        grid_spec=grid_spec,
        compiler_params=pltpu.CompilerParams(
            dimension_semantics=("parallel", "arbitrary"),
            vmem_limit_bytes=48 * 1024 * 1024,
        ),
        cost_estimate=cost,
    )(z_p, w1_p, g_p, bt_p, w2_p, b2_p)

    return out_p[:, :d_out]


def init_params(key, d_in, d_out):
    """Deterministic synthetic init (PyTorch-style uniform fan-in bounds)."""
    d_hidden = 2 * d_in
    k1, k2, k3, k4 = jax.random.split(key, 4)
    bound1 = 1.0 / jnp.sqrt(d_in)
    bound2 = 1.0 / jnp.sqrt(d_hidden)
    # Stored transposed w.r.t. PyTorch's (out, in) convention.
    w1 = jax.random.uniform(k1, (d_in, d_hidden), jnp.float32, -bound1, bound1)
    b1 = jax.random.uniform(k2, (1, d_hidden), jnp.float32, -bound1, bound1)
    w2 = jax.random.uniform(k3, (d_hidden, d_out), jnp.float32, -bound2, bound2)
    b2 = jax.random.uniform(k4, (1, d_out), jnp.float32, -bound2, bound2)
    gamma = jnp.ones((1, d_hidden), jnp.float32)   # BN weight
    beta = jnp.zeros((1, d_hidden), jnp.float32)   # BN bias
    return w1, b1, gamma, beta, w2, b2


def reference(z, w1, b1, gamma, beta, w2, b2):
    """Pure-JAX reference matching the PyTorch forward (including b1)."""
    h = z @ w1 + b1
    mean = jnp.mean(h, axis=0, keepdims=True)
    var = jnp.mean((h - mean) ** 2, axis=0, keepdims=True)
    hn = (h - mean) / jnp.sqrt(var + 1e-5) * gamma + beta
    a = jnp.where(hn >= 0, hn, 0.1 * hn)
    return a @ w2 + b2


if __name__ == "__main__":
    # --- small shapes consistent with the module ---
    d_in, d_out, bs = 32, 16, 8
    key = jax.random.PRNGKey(0)
    kz, kp = jax.random.split(key)
    z = jax.random.normal(kz, (bs, d_in), jnp.float32)
    params = init_params(kp, d_in, d_out)

    out = jax.block_until_ready(decoder_z_to_psi(z, *params))
    ref = reference(z, *params)
    assert out.shape == (bs, d_out)
    assert jnp.allclose(out, ref, atol=1e-4, rtol=1e-4), \
        float(jnp.max(jnp.abs(out - ref)))

    # --- slightly larger shapes that exercise the 2-D grid + accumulation ---
    d_in2, d_out2, bs2 = 512, 384, 64        # -> grid (3 out-tiles, 2 hid-tiles)
    kz2, kp2 = jax.random.split(jax.random.PRNGKey(1))
    z2 = jax.random.normal(kz2, (bs2, d_in2), jnp.float32)
    params2 = init_params(kp2, d_in2, d_out2)

    out2 = jax.block_until_ready(decoder_z_to_psi(z2, *params2))
    ref2 = reference(z2, *params2)
    assert out2.shape == (bs2, d_out2)
    assert jnp.allclose(out2, ref2, atol=2e-2, rtol=2e-2), \
        float(jnp.max(jnp.abs(out2 - ref2)))

    # --- bf16 matmul-operand path (2x MXU throughput, half the weight DMA) ---
    out_bf = jax.block_until_ready(
        decoder_z_to_psi(z2, *params2, mm_dtype=jnp.bfloat16))
    assert bool(jnp.all(jnp.isfinite(out_bf)))
    assert float(jnp.max(jnp.abs(out_bf - ref2))) < 0.25   # loose: bf16 operands

    print("KERNEL_OK")
</pallas_src>

<mosaic_0001>
module attributes {stable_mosaic.version = 11 : i64} {
  func.func @_decoder_kernel(%arg0: i32, %arg1: i32, %arg2: memref<8x128xf32, #tpu.memory_space<vmem>>, %arg3: memref<128x128xf32, #tpu.memory_space<vmem>>, %arg4: memref<1x128xf32, #tpu.memory_space<vmem>>, %arg5: memref<1x128xf32, #tpu.memory_space<vmem>>, %arg6: memref<128x128xf32, #tpu.memory_space<vmem>>, %arg7: memref<1x128xf32, #tpu.memory_space<vmem>>, %arg8: memref<8x128xf32, #tpu.memory_space<vmem>>, %arg9: memref<8x128xf32, #tpu.memory_space<vmem>>) attributes {dimension_semantics = [#tpu.dimension_semantics<parallel>, #tpu.dimension_semantics<arbitrary>], iteration_bounds = array<i64: 1, 1>, scalar_prefetch = 0 : i64, scratch_operands = 1 : i64, tpu.core_type = #tpu.core_type<tc>, window_params = [{pipeline_mode = #tpu.pipeline_mode<synchronous>, transform_indices = @transform_0, window_bounds = array<i64: 8, 128>}, {transform_indices = @transform_1, window_bounds = array<i64: 128, 128>}, {transform_indices = @transform_2, window_bounds = array<i64: 1, 128>}, {transform_indices = @transform_3, window_bounds = array<i64: 1, 128>}, {transform_indices = @transform_4, window_bounds = array<i64: 128, 128>}, {transform_indices = @transform_5, window_bounds = array<i64: 1, 128>}, {transform_indices = @transform_6, window_bounds = array<i64: 8, 128>}]} {
    %c0_i32 = arith.constant 0 : i32
    %0 = arith.cmpi eq, %arg1, %c0_i32 : i32
    %1 = arith.extui %0 : i1 to i32
    %c0_i32_0 = arith.constant 0 : i32
    %2 = arith.cmpi ne, %1, %c0_i32_0 : i32
    scf.if %2 {
      %cst_24 = arith.constant 0.000000e+00 : f32
      %43 = vector.broadcast %cst_24 : f32 to vector<8x128xf32>
      %c0_25 = arith.constant 0 : index
      %c0_26 = arith.constant 0 : index
      %44 = vector.load %arg9[%c0_25, %c0_26] : memref<8x128xf32, #tpu.memory_space<vmem>>, vector<8x128xf32>
      tpu.vector_store %arg9[%c0_25, %c0_26], %43 {strides = array<i32>} : memref<8x128xf32, #tpu.memory_space<vmem>>, vector<8x128xf32>,
    } else {
    }
    %c0 = arith.constant 0 : index
    %c0_1 = arith.constant 0 : index
    %3 = vector.load %arg2[%c0, %c0_1] : memref<8x128xf32, #tpu.memory_space<vmem>>, vector<8x128xf32>
    %c0_2 = arith.constant 0 : index
    %c0_3 = arith.constant 0 : index
    %4 = vector.load %arg3[%c0_2, %c0_3] : memref<128x128xf32, #tpu.memory_space<vmem>>, vector<128x128xf32>
    %cst = arith.constant dense<0.000000e+00> : vector<8x128xf32>
    %5 = tpu.matmul %3, %4, %cst {dimension_numbers = #tpu.dot_dimension_numbers<[1], [0], [0], [1], [0, 0, 1, 1], [], []>} : vector<8x128xf32>, vector<128x128xf32>, vector<8x128xf32> -> vector<8x128xf32>
    %cst_4 = arith.constant dense<0.000000e+00> : vector<128xf32>
    %6 = vector.multi_reduction <add>, %5, %cst_4 [0] : vector<8x128xf32> to vector<128xf32>
    %7 = vector.shape_cast %6 : vector<128xf32> to vector<1x128xf32>
    %cst_5 = arith.constant 8.000000e+00 : f32
    %8 = vector.broadcast %cst_5 : f32 to vector<1x128xf32>
    %9 = arith.divf %7, %8 : vector<1x128xf32>
    %10 = arith.mulf %5, %5 : vector<8x128xf32>
    %cst_6 = arith.constant dense<0.000000e+00> : vector<128xf32>
    %11 = vector.multi_reduction <add>, %10, %cst_6 [0] : vector<8x128xf32> to vector<128xf32>
    %12 = vector.shape_cast %11 : vector<128xf32> to vector<1x128xf32>
    %cst_7 = arith.constant 8.000000e+00 : f32
    %13 = vector.broadcast %cst_7 : f32 to vector<1x128xf32>
    %14 = arith.divf %12, %13 : vector<1x128xf32>
    %15 = arith.mulf %9, %9 : vector<1x128xf32>
    %16 = arith.subf %14, %15 : vector<1x128xf32>
    %cst_8 = arith.constant 0.000000e+00 : f32
    %17 = vector.broadcast %cst_8 : f32 to vector<1x128xf32>
    %18 = arith.maximumf %16, %17 : vector<1x128xf32>
    %19 = vector.broadcast %9 : vector<1x128xf32> to vector<8x128xf32>
    %20 = arith.subf %5, %19 : vector<8x128xf32>
    %cst_9 = arith.constant 9.99999974E-6 : f32
    %21 = vector.broadcast %cst_9 : f32 to vector<1x128xf32>
    %22 = arith.addf %18, %21 : vector<1x128xf32>
    %23 = math.rsqrt %22 : vector<1x128xf32>
    %24 = vector.broadcast %23 : vector<1x128xf32> to vector<8x128xf32>
    %25 = arith.mulf %20, %24 : vector<8x128xf32>
    %c0_10 = arith.constant 0 : index
    %c0_11 = arith.constant 0 : index
    %26 = vector.load %arg4[%c0_10, %c0_11] : memref<1x128xf32, #tpu.memory_space<vmem>>, vector<1x128xf32>
    %27 = vector.broadcast %26 : vector<1x128xf32> to vector<8x128xf32>
    %28 = arith.mulf %25, %27 : vector<8x128xf32>
    %c0_12 = arith.constant 0 : index
    %c0_13 = arith.constant 0 : index
    %29 = vector.load %arg5[%c0_12, %c0_13] : memref<1x128xf32, #tpu.memory_space<vmem>>, vector<1x128xf32>
    %30 = vector.broadcast %29 : vector<1x128xf32> to vector<8x128xf32>
    %31 = arith.addf %28, %30 : vector<8x128xf32>
    %cst_14 = arith.constant 1.000000e-01 : f32
    %32 = vector.broadcast %cst_14 : f32 to vector<8x128xf32>
    %33 = arith.mulf %32, %31 : vector<8x128xf32>
    %34 = arith.maximumf %31, %33 : vector<8x128xf32>
    %c0_15 = arith.constant 0 : index
    %c0_16 = arith.constant 0 : index
    %35 = vector.load %arg9[%c0_15, %c0_16] : memref<8x128xf32, #tpu.memory_space<vmem>>, vector<8x128xf32>
    %c0_17 = arith.constant 0 : index
    %c0_18 = arith.constant 0 : index
    %36 = vector.load %arg6[%c0_17, %c0_18] : memref<128x128xf32, #tpu.memory_space<vmem>>, vector<128x128xf32>
    %cst_19 = arith.constant dense<0.000000e+00> : vector<8x128xf32>
    %37 = tpu.matmul %34, %36, %cst_19 {dimension_numbers = #tpu.dot_dimension_numbers<[1], [0], [0], [1], [0, 0, 1, 1], [], []>} : vector<8x128xf32>, vector<128x128xf32>, vector<8x128xf32> -> vector<8x128xf32>
    %38 = arith.addf %35, %37 : vector<8x128xf32>
    %c0_20 = arith.constant 0 : index
    %c0_21 = arith.constant 0 : index
    %39 = vector.load %arg9[%c0_20, %c0_21] : memref<8x128xf32, #tpu.memory_space<vmem>>, vector<8x128xf32>
    tpu.vector_store %arg9[%c0_20, %c0_21], %38 {strides = array<i32>} : memref<8x128xf32, #tpu.memory_space<vmem>>, vector<8x128xf32>,
    %c0_i32_22 = arith.constant 0 : i32
    %40 = arith.cmpi eq, %arg1, %c0_i32_22 : i32
    %41 = arith.extui %40 : i1 to i32
    %c0_i32_23 = arith.constant 0 : i32
    %42 = arith.cmpi ne, %41, %c0_i32_23 : i32
    scf.if %42 {
      %c0_24 = arith.constant 0 : index
      %c0_25 = arith.constant 0 : index
      %43 = vector.load %arg9[%c0_24, %c0_25] : memref<8x128xf32, #tpu.memory_space<vmem>>, vector<8x128xf32>
      %c0_26 = arith.constant 0 : index
      %c0_27 = arith.constant 0 : index
      %44 = vector.load %arg7[%c0_26, %c0_27] : memref<1x128xf32, #tpu.memory_space<vmem>>, vector<1x128xf32>
      %45 = vector.broadcast %44 : vector<1x128xf32> to vector<8x128xf32>
      %46 = arith.addf %43, %45 : vector<8x128xf32>
      %c0_28 = arith.constant 0 : index
      %c0_29 = arith.constant 0 : index
      %47 = vector.load %arg8[%c0_28, %c0_29] : memref<8x128xf32, #tpu.memory_space<vmem>>, vector<8x128xf32>
      tpu.vector_store %arg8[%c0_28, %c0_29], %46 {strides = array<i32>} : memref<8x128xf32, #tpu.memory_space<vmem>>, vector<8x128xf32>,
    } else {
    }
    return
  }
  func.func @transform_0(%arg0: i32, %arg1: i32) -> (i32, i32) {
    %c0_i32 = arith.constant 0 : i32
    %c0_i32_0 = arith.constant 0 : i32
    %c0_i32_1 = arith.constant 0 : i32
    return %c0_i32, %c0_i32_0 : i32, i32
  }
  func.func @transform_1(%arg0: i32, %arg1: i32) -> (i32, i32) {
    %c0_i32 = arith.constant 0 : i32
    %c0_i32_0 = arith.constant 0 : i32
    return %c0_i32, %arg1 : i32, i32
  }
  func.func @transform_2(%arg0: i32, %arg1: i32) -> (i32, i32) {
    %c0_i32 = arith.constant 0 : i32
    %c0_i32_0 = arith.constant 0 : i32
    return %c0_i32, %arg1 : i32, i32
  }
  func.func @transform_3(%arg0: i32, %arg1: i32) -> (i32, i32) {
    %c0_i32 = arith.constant 0 : i32
    %c0_i32_0 = arith.constant 0 : i32
    return %c0_i32, %arg1 : i32, i32
  }
  func.func @transform_4(%arg0: i32, %arg1: i32) -> (i32, i32) {
    %c0_i32 = arith.constant 0 : i32
    return %arg1, %arg0 : i32, i32
  }
  func.func @transform_5(%arg0: i32, %arg1: i32) -> (i32, i32) {
    %c0_i32 = arith.constant 0 : i32
    %c0_i32_0 = arith.constant 0 : i32
    return %c0_i32, %arg0 : i32, i32
  }
  func.func @transform_6(%arg0: i32, %arg1: i32) -> (i32, i32) {
    %c0_i32 = arith.constant 0 : i32
    %c0_i32_0 = arith.constant 0 : i32
    return %c0_i32, %arg0 : i32, i32
  }
}

</mosaic_0001>

<bundles_post_ra>
// kernel: tpu_custom_call.1
= control target key start
LH: loop header
LB: loop body
LE: loop exit
PB: predicated region body
PF: predicated region fallthrough
CT: control target
= control target key end

     0   :  { %11 = vsyncpa [#allocation4], 0  ;;  %s697_s0 = inlined_call_operand.hbm [shape: f32[8,128], index: 0, kind: input, shape index: {}]   ;;  %s698_s1 = inlined_call_operand.hbm [shape: f32[128,128], index: 1, kind: input, shape index: {}]   ;;  %s699_s2 = inlined_call_operand.vmem [shape: f32[1,128], index: 2, kind: input, shape index: {}]   ;;  %s700_s3 = inlined_call_operand.vmem [shape: f32[1,128], index: 3, kind: input, shape index: {}]   ;;  %s701_s4 = inlined_call_operand.hbm [shape: f32[128,128], index: 4, kind: input, shape index: {}]   ;;  %s702_s5 = inlined_call_operand.vmem [shape: f32[1,128], index: 5, kind: input, shape index: {}]   ;;  %s703_s6 = inlined_call_operand.hbm [shape: f32[8,128], index: 6, kind: output, shape index: {}]  }
   0x1   :  { %12 = vsyncpa [#allocation7], 0 }
   0x2   :  { %13 = vsyncpa [#allocation5], 0  ;;  %s574_s21 = smov [#allocation6]   ;;  %s480_s25 = scalar_lea.hbm %s698_s1, 2048 }
   0x3   :  { %s29_s22 = sshll.u32 %s574_s21, 4  ;;  %p481_p0 = scmp.ne.s32.totalorder %s698_s1, %s480_s25  ;;  %s30_s22 = int_to_ptr.vmem [resolvable:$true] %s29_s22 }
   0x4   :  { %p484_p1 = scmp.lt.u32.totalorder %s480_s25, %s698_s1 }
   0x6   :  { %p486_p2 = pnand %p484_p1, %p481_p0 }
   0x8   :  { %489 = shalt.err (!%p486_p2)
}
   0x9   :  { %s490_s30 = scalar_lea.vmem %s30_s22, 2048  ;;  %p495_p4 = scmp.lt.s32.totalorder %s30_s22, %s30_s22 }
   0xa   :  { %p491_p3 = scmp.ne.s32.totalorder %s30_s22, %s490_s30  ;;  %p496_p5 = scmp.lt.s32.totalorder %s490_s30, %s490_s30 }
   0xc   :  { %p497_p6 = por %p496_p5, %p495_p4 }
   0xe   :  { %p498_p7 = pnand %p497_p6, %p491_p3 }
  0x10   :  { %501 = shalt.err (!%p498_p7)
}
  0x11   :  { %s575_s7 = smov 128   ;;  %s576_s8 = smov 8  }
  0x12   :  { %35 = dma.hbm_to_vmem [thread:$0]  %s698_s1, 2048, %s30_s22, [#allocation7], %s575_s7, %s575_s7, %s576_s8  }
  0x13   :  { %s577_s11 = smov [#allocation3]   ;;  %s578_s13 = smov [#allocation8]  }
  0x14   :  { %s20_s12 = sshll.u32 %s577_s11, 4  ;;  %s45_s14 = sshll.u32 %s578_s13, 4  ;;  %s21_s12 = int_to_ptr.vmem [resolvable:$true] %s20_s12  ;;  %s46_s14 = int_to_ptr.vmem [resolvable:$true] %s45_s14 }
  0x15   :  { %s502_s17 = scalar_lea.hbm %s697_s0, 128 }
  0x16   :  { %p503_p8 = scmp.ne.s32.totalorder %s697_s0, %s502_s17  ;;  %p506_p9 = scmp.lt.u32.totalorder %s502_s17, %s697_s0 }
  0x18   :  { %p508_p10 = pnand %p506_p9, %p503_p8 }
  0x1a   :  { %511 = shalt.err (!%p508_p10)
}
  0x1b   :  { %s512_s1 = scalar_lea.vmem %s21_s12, 128  ;;  %p517_p12 = scmp.lt.s32.totalorder %s21_s12, %s21_s12 }
  0x1c   :  { %p513_p11 = scmp.ne.s32.totalorder %s21_s12, %s512_s1  ;;  %p518_p13 = scmp.lt.s32.totalorder %s512_s1, %s512_s1 }
  0x1e   :  { %p519_p0 = por %p518_p13, %p517_p12 }
  0x20   :  { %p520_p1 = pnand %p519_p0, %p513_p11 }
  0x22   :  { %523 = shalt.err (!%p520_p1)
}
  0x23   :  { %23 = dma.hbm_to_vmem [thread:$0]  %s697_s0, 128, %s21_s12, [#allocation4]  }
  0x24   :  { %s524_s26 = scalar_lea.hbm %s701_s4, 2048 }
  0x25   :  { %p525_p2 = scmp.ne.s32.totalorder %s701_s4, %s524_s26  ;;  %p528_p3 = scmp.lt.u32.totalorder %s524_s26, %s701_s4 }
  0x27   :  { %p530_p4 = pnand %p528_p3, %p525_p2 }
  0x29   :  { %533 = shalt.err (!%p530_p4)
}
  0x2a   :  { %s534_s9 = scalar_lea.vmem %s46_s14, 2048  ;;  %p539_p6 = scmp.lt.s32.totalorder %s46_s14, %s46_s14 }
  0x2b   :  { %p535_p5 = scmp.ne.s32.totalorder %s46_s14, %s534_s9  ;;  %p540_p7 = scmp.lt.s32.totalorder %s534_s9, %s534_s9 }
  0x2d   :  { %p541_p8 = por %p540_p7, %p539_p6 }
  0x2f   :  { %p542_p9 = pnand %p541_p8, %p535_p5 }
  0x31   :  { %545 = shalt.err (!%p542_p9)
}
  0x32   :  { %51 = dma.hbm_to_vmem [thread:$0]  %s701_s4, 2048, %s46_s14, [#allocation7], %s575_s7, %s575_s7, %s576_s8  }
  0x33   :  { %568 = dma.done.wait [#allocation4], 128  }
  0x34   :  { %569 = vsyncadd [#allocation4], 4294967168 }
  0x35   :  { %570 = dma.done.wait [#allocation7], 4096  }
  0x36   :  { %571 = vsyncadd [#allocation7], 4294963200  ;;  %v579_v0 = vmov 0.0|0.0   ;;  %vm580_vm0 = vmmov 0   ;;  %v581_v1 = vmov 0.0   ;;  %v69_v2 = vld [vmem:[#allocation6] sm:$0xff] }
  0x37   :  { %421 = vmatprep.subr.bf16.mxu0 %v579_v0  ;;  %383 = vmatprep.mubr.msk.f32.mxu0 %vm580_vm0, %v581_v1  ;;  %v70_v3 = vld [vmem:[#allocation6 + $0x8] sm:$0xff]  ;;  %v71_v4 = vld [vmem:[#allocation6 + $0x10] sm:$0xff]  ;;  %v72_v6 = vld [vmem:[#allocation6 + $0x18] sm:$0xff]  ;;  %s582_s14 = smov [#allocation9]  }
  0x38   :  { %445 = vmatprep.subr.bf16.mxu1 %v579_v0  ;;  %418 = vmatprep.mubr.msk.f32.mxu1 %vm580_vm0, %v581_v1  ;;  %v422_v5 = vpack.c.bf16 %v70_v3, %v69_v2  ;;  %v425_v7 = vpack.c.bf16 %v72_v6, %v71_v4  ;;  %v73_v8 = vld [vmem:[#allocation6 + $0x20] sm:$0xff]  ;;  %v74_v9 = vld [vmem:[#allocation6 + $0x28] sm:$0xff]  ;;  %v75_v11 = vld [vmem:[#allocation6 + $0x30] sm:$0xff]  ;;  %s304_s15 = sshll.u32 %s582_s14, 4  ;;  %s305_s15 = int_to_ptr.vmem [resolvable:$true] %s304_s15 }
  0x39   :  { %v428_v10 = vpack.c.bf16 %v74_v9, %v73_v8  ;;  %v76_v12 = vld [vmem:[#allocation6 + $0x38] sm:$0xff]  ;;  %v77_v14 = vld [vmem:[#allocation6 + $0x40] sm:$0xff]  ;;  %v78_v15 = vld [vmem:[#allocation6 + $0x48] sm:$0xff]  ;;  %p551_p11 = scmp.lt.s32.totalorder %s305_s15, %s305_s15 }
  0x3a   :  { %423 = vmatpush3.bf16.msra.mxu0 %v422_v5  ;;  %v431_v13 = vpack.c.bf16 %v76_v12, %v75_v11  ;;  %v434_v16 = vpack.c.bf16 %v78_v15, %v77_v14  ;;  %v79_v17 = vld [vmem:[#allocation6 + $0x50] sm:$0xff]  ;;  %v80_v18 = vld [vmem:[#allocation6 + $0x58] sm:$0xff]  ;;  %v81_v20 = vld [vmem:[#allocation6 + $0x60] sm:$0xff] }
  0x3b   :  { %424 = vmatprep.subr.bf16.mxu0 %v579_v0  ;;  %v437_v19 = vpack.c.bf16 %v80_v18, %v79_v17  ;;  %v82_v21 = vld [vmem:[#allocation6 + $0x68] sm:$0xff]  ;;  %v83_v23 = vld [vmem:[#allocation6 + $0x70] sm:$0xff]  ;;  %v84_v24 = vld [vmem:[#allocation6 + $0x78] sm:$0xff] }
  0x3c   :  { %v440_v22 = vpack.c.bf16 %v82_v21, %v81_v20  ;;  %v443_v25 = vpack.c.bf16 %v84_v24, %v83_v23  ;;  %v68_v26 = vld [vmem:[#allocation3] sm:$0xff]  ;;  %v197_v27 = vld [vmem:[#allocation8] sm:$0xff]  ;;  %v198_v28 = vld [vmem:[#allocation8 + $0x8] sm:$0xff] }
  0x3d   :  { %v446_v29 = vpack.c.bf16 %v198_v28, %v197_v27  ;;  %v199_v30 = vld [vmem:[#allocation8 + $0x10] sm:$0xff]  ;;  %v200_v31 = vld [vmem:[#allocation8 + $0x18] sm:$0xff]  ;;  %v201_v33 = vld [vmem:[#allocation8 + $0x20] sm:$0xff] }
  0x3e   :  { %426 = vmatpush3.bf16.msra.mxu0 %v425_v7  ;;  %v449_v32 = vpack.c.bf16 %v200_v31, %v199_v30  ;;  %v202_v34 = vld [vmem:[#allocation8 + $0x28] sm:$0xff]  ;;  %v203_v36 = vld [vmem:[#allocation8 + $0x30] sm:$0xff]  ;;  %v204_v37 = vld [vmem:[#allocation8 + $0x38] sm:$0xff] }
  0x3f   :  { %427 = vmatprep.subr.bf16.mxu0 %v579_v0  ;;  %447 = vmatpush3.bf16.msra.mxu1 %v446_v29  ;;  %v452_v35 = vpack.c.bf16 %v202_v34, %v201_v33  ;;  %v455_v38 = vpack.c.bf16 %v204_v37, %v203_v36  ;;  %v205_v39 = vld [vmem:[#allocation8 + $0x40] sm:$0xff]  ;;  %v206_v40 = vld [vmem:[#allocation8 + $0x48] sm:$0xff]  ;;  %v207_v42 = vld [vmem:[#allocation8 + $0x50] sm:$0xff] }
  0x40   :  { %448 = vmatprep.subr.bf16.mxu1 %v579_v0  ;;  %v458_v41 = vpack.c.bf16 %v206_v40, %v205_v39  ;;  %v208_v43 = vld [vmem:[#allocation8 + $0x58] sm:$0xff]  ;;  %v209_v45 = vld [vmem:[#allocation8 + $0x60] sm:$0xff]  ;;  %v210_v46 = vld [vmem:[#allocation8 + $0x68] sm:$0xff] }
  0x41   :  { %v461_v44 = vpack.c.bf16 %v208_v43, %v207_v42  ;;  %v211_v47 = vld [vmem:[#allocation8 + $0x70] sm:$0xff]  ;;  %v464_v48 = vpack.c.bf16 %v210_v46, %v209_v45  ;;  %v212_v49 = vld [vmem:[#allocation8 + $0x78] sm:$0xff] }
  0x42   :  { %429 = vmatpush3.bf16.msra.mxu0 %v428_v10  ;;  %v467_v50 = vpack.c.bf16 %v212_v49, %v211_v47  ;;  %v314_v10 = vld [vmem:[%s699_s2] ss:$0 sm:$0xff]  ;;  %s546_s2 = scalar_lea.vmem %s305_s15, 128 }
  0x43   :  { %430 = vmatprep.subr.bf16.mxu0 %v579_v0  ;;  %450 = vmatpush3.bf16.msra.mxu1 %v449_v32  ;;  %v315_v12 = vld [vmem:[%s700_s3] ss:$0 sm:$0xff]  ;;  %p547_p10 = scmp.ne.s32.totalorder %s305_s15, %s546_s2  ;;  %p552_p12 = scmp.lt.s32.totalorder %s546_s2, %s546_s2 }
  0x44   :  { %451 = vmatprep.subr.bf16.mxu1 %v579_v0  ;;  %v316_v17 = vld [vmem:[%s702_s5] ss:$0 sm:$0xff] }
  0x45   :  { %p553_p13 = por %p552_p12, %p551_p11 }
  0x46   :  { %432 = vmatpush3.bf16.msra.mxu0 %v431_v13 }
  0x47   :  { %433 = vmatprep.subr.bf16.mxu0 %v579_v0  ;;  %453 = vmatpush3.bf16.msra.mxu1 %v452_v35  ;;  %p554_p0 = pnand %p553_p13, %p547_p10 }
  0x48   :  { %454 = vmatprep.subr.bf16.mxu1 %v579_v0 }
  0x4a   :  { %435 = vmatpush3.bf16.msra.mxu0 %v434_v16 }
  0x4b   :  { %436 = vmatprep.subr.bf16.mxu0 %v579_v0  ;;  %456 = vmatpush3.bf16.msra.mxu1 %v455_v38 }
  0x4c   :  { %457 = vmatprep.subr.bf16.mxu1 %v579_v0 }
  0x4e   :  { %438 = vmatpush3.bf16.msra.mxu0 %v437_v19 }
  0x4f   :  { %439 = vmatprep.subr.bf16.mxu0 %v579_v0  ;;  %459 = vmatpush3.bf16.msra.mxu1 %v458_v41 }
  0x50   :  { %460 = vmatprep.subr.bf16.mxu1 %v579_v0 }
  0x52   :  { %441 = vmatpush3.bf16.msra.mxu0 %v440_v22 }
  0x53   :  { %442 = vmatprep.subr.bf16.mxu0 %v579_v0  ;;  %462 = vmatpush3.bf16.msra.mxu1 %v461_v44 }
  0x54   :  { %463 = vmatprep.subr.bf16.mxu1 %v579_v0 }
  0x56   :  { %444 = vmatpush3.bf16.msra.mxu0 %v443_v25 }
  0x57   :  { %465 = vmatpush3.bf16.msra.mxu1 %v464_v48 }
  0x58   :  { %466 = vmatprep.subr.bf16.mxu1 %v579_v0 }
  0x59   :  { %384 = vmatmul.mubr.f32.vlgmr.msra.gmra.mrb[0].mxu0 %v68_v26 }
  0x5b   :  { %468 = vmatpush3.bf16.msra.mxu1 %v467_v50 }
 0x12c   :  { %v151_v51 = vpop.f32.mrb[0].mxu0 }
 0x12d   :  { %v155_v52 = vrot.slane %v151_v51, 4  ;;  %v163_v53 = vmul.f32 %v151_v51, %v151_v51  ;;  %v385_v54 = vpop.f32.mrb[1].mxu0 }
 0x12f   :  { %v156_v55 = vadd.f32 %v155_v52, %v151_v51  ;;  %v164_v56 = vrot.slane %v163_v53, 4 }
 0x131   :  { %v157_v57 = vrot.slane %v156_v55, 2  ;;  %v165_v58 = vadd.f32 %v164_v56, %v163_v53 }
 0x133   :  { %v158_v59 = vadd.f32 %v157_v57, %v156_v55  ;;  %v166_v60 = vrot.slane %v165_v58, 2 }
 0x135   :  { %v159_v61 = vrot.slane %v158_v59, 1  ;;  %v167_v62 = vadd.f32 %v166_v60, %v165_v58 }
 0x137   :  { %v160_v63 = vadd.f32 %v159_v61, %v158_v59  ;;  %v168_v1 = vrot.slane %v167_v62, 1 }
 0x139   :  { %v162_v2 = vmul.f32 0.125, %v160_v63  ;;  %v169_v3 = vadd.f32 %v168_v1, %v167_v62 }
 0x13b   :  { %v170_v4 = vmul.f32 0.125, %v169_v3  ;;  %v171_v5 = vmul.f32 %v162_v2, %v162_v2  ;;  %v174_v8 = vsub.f32 %v151_v51, %v162_v2 }
 0x13d   :  { %v172_v0 = vsub.f32 %v170_v4, %v171_v5 }
 0x13f   :  { %v173_v6 = vmax.f32 %v172_v0, 0.0 }
 0x141   :  { %v175_v7 = vadd.f32 1e-05, %v173_v6 }
 0x143   :  { %478 = vrsqrt.f32 %v175_v7 }
 0x14d   :  { %v479_v9 = vpop.eup %478 }
 0x14e   :  { %v177_v11 = vmul.f32 %v479_v9, %v174_v8 }
 0x150   :  { %v185_v13 = vmul.f32 %v314_v10, %v177_v11 }
 0x152   :  { %v193_v14 = vadd.f32 %v315_v12, %v185_v13 }
 0x154   :  { %v194_v15 = vmul.f32 0.1, %v193_v14 }
 0x156   :  { %v195_v16 = vmax.f32 %v193_v14, %v194_v15 }
 0x158   :  { %419 = vmatmul.mubr.f32.vlgmr.msra.gmra.mrb[0].mxu1 %v195_v16 }
 0x22b   :  { %v279_v18 = vpop.f32.mrb[0].mxu1 }
 0x22c   :  { %v296_v19 = vadd.f32 %v316_v17, %v279_v18  ;;  %v420_v20 = vpop.f32.mrb[1].mxu1 }
 0x22e   :  { %297 = vst [vmem:[#allocation9] sm:$0xff] %v296_v19 }
 0x22f   :  { %557 = shalt.err (!%p554_p0)
}
 0x230   :  { %s558_s17 = scalar_lea.hbm %s703_s6, 128 }
 0x231   :  { %p559_p1 = scmp.ne.s32.totalorder %s703_s6, %s558_s17  ;;  %p562_p2 = scmp.lt.u32.totalorder %s558_s17, %s703_s6 }
 0x233   :  { %p564_p3 = pnand %p562_p2, %p559_p1 }
 0x235   :  { %567 = shalt.err (!%p564_p3)
}
 0x236   :  { %307 = dma.vmem_to_hbm [thread:$0]  %s305_s15, 128, %s703_s6, [#allocation5]  }
 0x237   :  { %572 = dma.done.wait [#allocation5], 128  }
 0x238   :  { %573 = vsyncadd [#allocation5], 4294967168 }
 0x239   :  { %311 = vsyncpa [#allocation4], 1 }
 0x23a   :  { %312 = vsyncpa [#allocation7], 1 }
 0x23b   :  { %313 = vsyncpa [#allocation5], 1 }

</bundles_post_ra>
